<compile_context>
chip_gen: v5e
topology: v5e:2x2
jax: 0.10.0
libtpu: 0.0.40
codegen_flags: <defaults>
</compile_context>

<pallas_src>
import jax
import jax.numpy as jnp
from jax.experimental import pallas as pl
from jax.experimental.pallas import tpu as pltpu

EPS = 1e-5


def _round_up(x, m):
    return (x + m - 1) // m * m


def prenorm_kernel(x_ref, gamma_ref, beta_ref, w_ref, bias_ref, o_ref):
    # x_ref: (TR, D) rows of tokens; D is the full (unpadded) channel dim, so
    # reductions over the last axis see exactly the real channels.
    x = x_ref[...].astype(jnp.float32)
    d = x.shape[-1]
    inv_d = 1.0 / float(d)

    # --- LayerNorm over the last dim, unbiased=False (torch default) ---
    # Single-pass statistics: sum(x) and sum(x*x) have no data dependency,
    # so the two XLU reductions pipeline; no centered temp, no lane mask.
    s1 = jnp.sum(x, axis=-1, keepdims=True)
    s2 = jnp.sum(x * x, axis=-1, keepdims=True)
    mean = s1 * inv_d
    var = jnp.maximum(s2 * inv_d - mean * mean, 0.0)
    rstd = jax.lax.rsqrt(var + EPS)
    y = (x - mean) * rstd
    y = y * gamma_ref[...].astype(jnp.float32) + beta_ref[...].astype(jnp.float32)

    # --- fn == Linear(dim, dim): y @ W + b on the MXU ---
    # Cast activations to the weight dtype (bf16 weights -> native bf16 MXU),
    # always accumulate in f32.
    y = y.astype(w_ref.dtype)
    out = jnp.dot(y, w_ref[...], preferred_element_type=jnp.float32)
    out = out + bias_ref[...].astype(jnp.float32)
    o_ref[...] = out.astype(o_ref.dtype)


def prenorm(x, gamma, beta, w, bias, *, compute_dtype=None, row_tile=1024):
    """x: (B, N, D) -> (B, N, D).  Pass bf16 `x`/`w` (or compute_dtype=bf16)
    for the bf16 HBM/MXU path; LayerNorm math is always f32."""
    B, N, D = x.shape
    rows = B * N
    if compute_dtype is None:
        compute_dtype = w.dtype                  # matmul operand dtype

    # Row tile: aim for >= 4 grid steps (software pipelining; both TCs on v7x)
    # while staying a multiple of 8 rows; fall back to one full block for tiny
    # inputs.  No padding: Pallas masks the partial last block on write.
    TR = min(row_tile, max(256, _round_up(pl.cdiv(rows, 4), 256)))
    if TR >= rows:
        TR = rows
    grid = (pl.cdiv(rows, TR),)

    # --- no HBM round trips: plain reshapes only (row-major collapse is free) ---
    x2 = x.reshape(rows, D)
    gamma2 = gamma.astype(jnp.float32).reshape(1, D)
    beta2 = beta.astype(jnp.float32).reshape(1, D)
    bias2 = bias.astype(jnp.float32).reshape(1, D)
    w2 = w.astype(compute_dtype)

    x_itemsize = jnp.dtype(x.dtype).itemsize
    w_itemsize = jnp.dtype(compute_dtype).itemsize
    cost = pl.CostEstimate(
        flops=2 * rows * D * D,
        transcendentals=0,
        bytes_accessed=2 * rows * D * x_itemsize + D * D * w_itemsize + 3 * D * 4,
    )

    # VMEM budget: double-buffered x/out tiles + resident W/params + f32 temps,
    # plus headroom; cap at 3/4 of the actual chip's VMEM (128 MiB v5e/v6e,
    # 64 MiB per-TC v7x) instead of a one-size-fits-all clamp.
    vmem_bytes = (
        2 * TR * D * x_itemsize           # x double buffer
        + 2 * TR * D * x_itemsize         # out double buffer
        + 2 * D * D * w_itemsize          # W (resident, default double buffer)
        + 6 * D * 4                       # gamma/beta/bias
        + 4 * TR * D * 4                  # f32 intermediates
        + (8 << 20)                       # headroom
    )
    try:
        phys_vmem = int(pltpu.get_tpu_info().vmem_capacity_bytes)
    except Exception:
        phys_vmem = 64 << 20              # conservative (v7x per-TC)
    vmem_limit = int(min(max(vmem_bytes, 16 << 20), phys_vmem * 3 // 4))

    out = pl.pallas_call(
        prenorm_kernel,
        out_shape=jax.ShapeDtypeStruct((rows, D), x.dtype),
        grid_spec=pl.GridSpec(
            grid=grid,
            in_specs=[
                pl.BlockSpec((TR, D), lambda i: (i, 0)),   # x row tile
                pl.BlockSpec((1, D), lambda i: (0, 0)),    # gamma (resident)
                pl.BlockSpec((1, D), lambda i: (0, 0)),    # beta  (resident)
                pl.BlockSpec((D, D), lambda i: (0, 0)),    # W     (resident)
                pl.BlockSpec((1, D), lambda i: (0, 0)),    # bias  (resident)
            ],
            out_specs=pl.BlockSpec((TR, D), lambda i: (i, 0)),
        ),
        compiler_params=pltpu.CompilerParams(
            dimension_semantics=("parallel",),   # independent row tiles -> 2 TCs on v7x
            vmem_limit_bytes=vmem_limit,
        ),
        cost_estimate=cost,
    )(x2, gamma2, beta2, w2, bias2)

    return out.reshape(B, N, D)


def prenorm_reference(x, gamma, beta, w, bias):
    xf = x.astype(jnp.float32)
    mean = jnp.mean(xf, axis=-1, keepdims=True)
    var = jnp.mean((xf - mean) ** 2, axis=-1, keepdims=True)
    xn = (xf - mean) / jnp.sqrt(var + EPS)
    y = xn * gamma + beta
    return (y @ w + bias).astype(x.dtype)


if __name__ == "__main__":
    key = jax.random.PRNGKey(0)
    k_x, k_g, k_b, k_w, k_bias = jax.random.split(key, 5)

    B, N, D = 2, 8, 32          # batch, tokens, dim (small test shape)
    x = jax.random.normal(k_x, (B, N, D), dtype=jnp.float32)

    # nn.LayerNorm(dim) params (perturbed from ones/zeros so affine is exercised)
    gamma = 1.0 + 0.01 * jax.random.normal(k_g, (D,), dtype=jnp.float32)
    beta = 0.01 * jax.random.normal(k_b, (D,), dtype=jnp.float32)

    # fn := Linear(dim, dim) params
    w = 0.1 * jax.random.normal(k_w, (D, D), dtype=jnp.float32)
    bias = 0.01 * jax.random.normal(k_bias, (D,), dtype=jnp.float32)

    # f32 path vs. reference
    out = jax.block_until_ready(prenorm(x, gamma, beta, w, bias))
    ref = prenorm_reference(x, gamma, beta, w, bias)
    assert out.shape == (B, N, D)
    assert jnp.allclose(out, ref, atol=1e-4, rtol=1e-4), "f32 mismatch vs reference"

    # bf16 activation/weight path (recommended deployment: halves HBM traffic,
    # native bf16 MXU); LN math stays f32 inside the kernel.
    x_bf = x.astype(jnp.bfloat16)
    w_bf = w.astype(jnp.bfloat16)
    out_bf = jax.block_until_ready(prenorm(x_bf, gamma, beta, w_bf, bias))
    assert out_bf.dtype == jnp.bfloat16
    assert jnp.allclose(out_bf.astype(jnp.float32), ref, atol=6e-2, rtol=6e-2), \
        "bf16 mismatch vs reference"

    print("KERNEL_OK")
</pallas_src>

<mosaic_0001>
module attributes {stable_mosaic.version = 11 : i64} {
  func.func @prenorm_kernel(%arg0: i32, %arg1: memref<16x32xf32, #tpu.memory_space<vmem>>, %arg2: memref<1x32xf32, #tpu.memory_space<vmem>>, %arg3: memref<1x32xf32, #tpu.memory_space<vmem>>, %arg4: memref<32x32xf32, #tpu.memory_space<vmem>>, %arg5: memref<1x32xf32, #tpu.memory_space<vmem>>, %arg6: memref<16x32xf32, #tpu.memory_space<vmem>>) attributes {dimension_semantics = [#tpu.dimension_semantics<parallel>], iteration_bounds = array<i64: 1>, scalar_prefetch = 0 : i64, scratch_operands = 0 : i64, tpu.core_type = #tpu.core_type<tc>, window_params = [{transform_indices = @transform_0, window_bounds = array<i64: 16, 32>}, {pipeline_mode = #tpu.pipeline_mode<synchronous>, transform_indices = @transform_1, window_bounds = array<i64: 1, 32>}, {pipeline_mode = #tpu.pipeline_mode<synchronous>, transform_indices = @transform_2, window_bounds = array<i64: 1, 32>}, {pipeline_mode = #tpu.pipeline_mode<synchronous>, transform_indices = @transform_3, window_bounds = array<i64: 32, 32>}, {pipeline_mode = #tpu.pipeline_mode<synchronous>, transform_indices = @transform_4, window_bounds = array<i64: 1, 32>}, {transform_indices = @transform_5, window_bounds = array<i64: 16, 32>}]} {
    %c0 = arith.constant 0 : index
    %c0_0 = arith.constant 0 : index
    %0 = vector.load %arg1[%c0, %c0_0] : memref<16x32xf32, #tpu.memory_space<vmem>>, vector<16x32xf32>
    %cst = arith.constant dense<0.000000e+00> : vector<16xf32>
    %1 = vector.multi_reduction <add>, %0, %cst [1] : vector<16x32xf32> to vector<16xf32>
    %2 = vector.shape_cast %1 : vector<16xf32> to vector<16x1xf32>
    %3 = arith.mulf %0, %0 : vector<16x32xf32>
    %cst_1 = arith.constant dense<0.000000e+00> : vector<16xf32>
    %4 = vector.multi_reduction <add>, %3, %cst_1 [1] : vector<16x32xf32> to vector<16xf32>
    %5 = vector.shape_cast %4 : vector<16xf32> to vector<16x1xf32>
    %cst_2 = arith.constant 3.125000e-02 : f32
    %6 = vector.broadcast %cst_2 : f32 to vector<16x1xf32>
    %7 = arith.mulf %2, %6 : vector<16x1xf32>
    %cst_3 = arith.constant 3.125000e-02 : f32
    %8 = vector.broadcast %cst_3 : f32 to vector<16x1xf32>
    %9 = arith.mulf %5, %8 : vector<16x1xf32>
    %10 = arith.mulf %7, %7 : vector<16x1xf32>
    %11 = arith.subf %9, %10 : vector<16x1xf32>
    %cst_4 = arith.constant 0.000000e+00 : f32
    %12 = vector.broadcast %cst_4 : f32 to vector<16x1xf32>
    %13 = arith.maximumf %11, %12 : vector<16x1xf32>
    %cst_5 = arith.constant 9.99999974E-6 : f32
    %14 = vector.broadcast %cst_5 : f32 to vector<16x1xf32>
    %15 = arith.addf %13, %14 : vector<16x1xf32>
    %16 = math.rsqrt %15 : vector<16x1xf32>
    %17 = vector.broadcast %7 : vector<16x1xf32> to vector<16x32xf32>
    %18 = arith.subf %0, %17 : vector<16x32xf32>
    %19 = vector.broadcast %16 : vector<16x1xf32> to vector<16x32xf32>
    %20 = arith.mulf %18, %19 : vector<16x32xf32>
    %c0_6 = arith.constant 0 : index
    %c0_7 = arith.constant 0 : index
    %21 = vector.load %arg2[%c0_6, %c0_7] : memref<1x32xf32, #tpu.memory_space<vmem>>, vector<1x32xf32>
    %22 = vector.broadcast %21 : vector<1x32xf32> to vector<16x32xf32>
    %23 = arith.mulf %20, %22 : vector<16x32xf32>
    %c0_8 = arith.constant 0 : index
    %c0_9 = arith.constant 0 : index
    %24 = vector.load %arg3[%c0_8, %c0_9] : memref<1x32xf32, #tpu.memory_space<vmem>>, vector<1x32xf32>
    %25 = vector.broadcast %24 : vector<1x32xf32> to vector<16x32xf32>
    %26 = arith.addf %23, %25 : vector<16x32xf32>
    %c0_10 = arith.constant 0 : index
    %c0_11 = arith.constant 0 : index
    %27 = vector.load %arg4[%c0_10, %c0_11] : memref<32x32xf32, #tpu.memory_space<vmem>>, vector<32x32xf32>
    %cst_12 = arith.constant dense<0.000000e+00> : vector<16x32xf32>
    %28 = tpu.matmul %26, %27, %cst_12 {dimension_numbers = #tpu.dot_dimension_numbers<[1], [0], [0], [1], [0, 0, 1, 1], [], []>} : vector<16x32xf32>, vector<32x32xf32>, vector<16x32xf32> -> vector<16x32xf32>
    %c0_13 = arith.constant 0 : index
    %c0_14 = arith.constant 0 : index
    %29 = vector.load %arg5[%c0_13, %c0_14] : memref<1x32xf32, #tpu.memory_space<vmem>>, vector<1x32xf32>
    %30 = vector.broadcast %29 : vector<1x32xf32> to vector<16x32xf32>
    %31 = arith.addf %28, %30 : vector<16x32xf32>
    %c0_15 = arith.constant 0 : index
    %c0_16 = arith.constant 0 : index
    %32 = vector.load %arg6[%c0_15, %c0_16] : memref<16x32xf32, #tpu.memory_space<vmem>>, vector<16x32xf32>
    tpu.vector_store %arg6[%c0_15, %c0_16], %31 {strides = array<i32>} : memref<16x32xf32, #tpu.memory_space<vmem>>, vector<16x32xf32>,
    return
  }
  func.func @transform_0(%arg0: i32) -> (i32, i32) {
    %c0_i32 = arith.constant 0 : i32
    %c0_i32_0 = arith.constant 0 : i32
    return %arg0, %c0_i32 : i32, i32
  }
  func.func @transform_1(%arg0: i32) -> (i32, i32) {
    %c0_i32 = arith.constant 0 : i32
    %c0_i32_0 = arith.constant 0 : i32
    %c0_i32_1 = arith.constant 0 : i32
    return %c0_i32, %c0_i32_0 : i32, i32
  }
  func.func @transform_2(%arg0: i32) -> (i32, i32) {
    %c0_i32 = arith.constant 0 : i32
    %c0_i32_0 = arith.constant 0 : i32
    %c0_i32_1 = arith.constant 0 : i32
    return %c0_i32, %c0_i32_0 : i32, i32
  }
  func.func @transform_3(%arg0: i32) -> (i32, i32) {
    %c0_i32 = arith.constant 0 : i32
    %c0_i32_0 = arith.constant 0 : i32
    %c0_i32_1 = arith.constant 0 : i32
    return %c0_i32, %c0_i32_0 : i32, i32
  }
  func.func @transform_4(%arg0: i32) -> (i32, i32) {
    %c0_i32 = arith.constant 0 : i32
    %c0_i32_0 = arith.constant 0 : i32
    %c0_i32_1 = arith.constant 0 : i32
    return %c0_i32, %c0_i32_0 : i32, i32
  }
  func.func @transform_5(%arg0: i32) -> (i32, i32) {
    %c0_i32 = arith.constant 0 : i32
    %c0_i32_0 = arith.constant 0 : i32
    return %arg0, %c0_i32 : i32, i32
  }
}

</mosaic_0001>

<bundles_post_ra>
// kernel: tpu_custom_call.1
= control target key start
LH: loop header
LB: loop body
LE: loop exit
PB: predicated region body
PF: predicated region fallthrough
CT: control target
= control target key end

     0   :  { %10 = vsyncpa [#allocation3], 0  ;;  %s388_s0 = inlined_call_operand.hbm [shape: f32[16,32], index: 0, kind: input, shape index: {}]   ;;  %s389_s1 = inlined_call_operand.hbm [shape: f32[1,32], index: 1, kind: input, shape index: {}]   ;;  %s390_s2 = inlined_call_operand.vmem [shape: f32[1,32], index: 2, kind: input, shape index: {}]   ;;  %s391_s3 = inlined_call_operand.hbm [shape: f32[32,32], index: 3, kind: input, shape index: {}]   ;;  %s392_s4 = inlined_call_operand.vmem [shape: f32[1,32], index: 4, kind: input, shape index: {}]   ;;  %s393_s5 = inlined_call_operand.hbm [shape: f32[16,32], index: 5, kind: output, shape index: {}]  }
   0x1   :  { %11 = vsyncpa [#allocation6], 0  ;;  %s31_s20 = sshll.u32 %s389_s1, 4  ;;  %s32_s20 = int_to_ptr.hbm [resolvable:$true] %s31_s20 }
   0x2   :  { %12 = vsyncpa [#allocation4], 0  ;;  %s311_s21 = smov [#allocation5]   ;;  %s17_s25 = sshll.u32 %s388_s0, 4  ;;  %s18_s25 = int_to_ptr.hbm [resolvable:$true] %s17_s25 }
   0x3   :  { %s33_s22 = sshll.u32 %s311_s21, 4  ;;  %s312_s26 = smov [#allocation2]   ;;  %s34_s22 = int_to_ptr.vmem [resolvable:$true] %s33_s22 }
   0x4   :  { %36 = dma.hbm_to_vmem [thread:$0]  %s32_s20, 16, %s34_s22, [#allocation6]  }
   0x5   :  { %s19_s27 = sshll.u32 %s312_s26, 4  ;;  %s313_s28 = smov 128   ;;  %s20_s27 = int_to_ptr.vmem [resolvable:$true] %s19_s27 }
   0x6   :  { %s314_s29 = smov 8   ;;  %s43_s6 = sshll.u32 %s391_s3, 4  ;;  %s44_s6 = int_to_ptr.hbm [resolvable:$true] %s43_s6 }
   0x7   :  { %25 = dma.hbm_to_vmem [thread:$0]  %s18_s25, 256, %s20_s27, [#allocation3], %s313_s28, %s313_s28, %s314_s29  }
   0x8   :  { %s315_s7 = smov [#allocation7]  }
   0x9   :  { %s45_s8 = sshll.u32 %s315_s7, 4  ;;  %s46_s8 = int_to_ptr.vmem [resolvable:$true] %s45_s8 }
   0xa   :  { %51 = dma.hbm_to_vmem [thread:$0]  %s44_s6, 512, %s46_s8, [#allocation6], %s313_s28, %s313_s28, %s314_s29  }
   0xb   :  { %305 = dma.done.wait [#allocation3], 256  }
   0xc   :  { %306 = vsyncadd [#allocation3], 4294967040 }
   0xd   :  { %307 = dma.done.wait [#allocation6], 528  }
   0xe   :  { %308 = vsyncadd [#allocation6], 4294966768  ;;  %vm68_vm0 = vcmask 261120   ;;  %v66_v0 = vld [vmem:[#allocation2] sm:$0xff]  ;;  %v363_v3 = vld [vmem:[#allocation2 + $0x8] sm:$0xff]  ;;  %s316_s10 = smov [#allocation8]  }
   0xf   :  { %v69_v1 = vsel %vm68_vm0, %v66_v0, 0.0  ;;  %v75_v2 = vmul.f32 %v66_v0, %v66_v0  ;;  %v76_v5 = vmul.f32 %v363_v3, %v363_v3  ;;  %v72_v6 = vsel %vm68_vm0, %v363_v3, 0.0  ;;  %v134_v8 = vld [vmem:[#allocation7 + $0x18] sm:$0xff]  ;;  %v133_v9 = vld [vmem:[#allocation7 + $0x10] sm:$0xff]  ;;  %v132_v11 = vld [vmem:[#allocation7 + $0x8] sm:$0xff]  ;;  %s174_s11 = sshll.u32 %s316_s10, 4  ;;  %s175_s11 = int_to_ptr.vmem [resolvable:$true] %s174_s11 }
  0x10   :  { %70 = vadd.xlane.f32.xlu0 %v69_v1  ;;  %157 = vmatpush.msra.mxu0 %v134_v8  ;;  %v131_v14 = vld [vmem:[#allocation7] sm:$0xff]  ;;  %v202_v37 = vld [vmem:[#allocation5] ss:$0 sm:$0xff]  ;;  %v203_v41 = vld [vmem:[%s390_s2] ss:$0 sm:$0xff]  ;;  %s176_s14 = sshll.u32 %s393_s5, 4  ;;  %s177_s14 = int_to_ptr.hbm [resolvable:$true] %s176_s14 }
  0x11   :  { %v77_v4 = vsel %vm68_vm0, %v75_v2, 0.0  ;;  %v80_v7 = vsel %vm68_vm0, %v76_v5, 0.0  ;;  %192 = vmatpush.msra.mxu1 %v134_v8  ;;  %v204_v52 = vld [vmem:[%s392_s4] ss:$0 sm:$0xff] }
  0x12   :  { %78 = vadd.xlane.f32.xlu1 %v77_v4  ;;  %158 = vmatpush.msra.mxu0 %v133_v9 }
  0x13   :  { %193 = vmatpush.msra.mxu1 %v133_v9 }
  0x14   :  { %159 = vmatpush.msra.mxu0 %v132_v11 }
  0x15   :  { %194 = vmatpush.msra.mxu1 %v132_v11 }
  0x16   :  { %160 = vmatpush.msra.mxu0 %v131_v14 }
  0x17   :  { %195 = vmatpush.msra.mxu1 %v131_v14 }
  0x18   :  { %73 = vadd.xlane.f32.xlu0 %v72_v6 }
  0x1a   :  { %81 = vadd.xlane.f32.xlu1 %v80_v7 }
  0x83   :  { %v71_v10 = vpop.xlane.xlu0 %70 }
  0x84   :  { %v83_v12 = vmul.f32 0.03125, %v71_v10 }
  0x85   :  { %v79_v13 = vpop.xlane.xlu1 %78 }
  0x86   :  { %v87_v15 = vmul.f32 %v83_v12, %v83_v12  ;;  %v85_v16 = vmul.f32 0.03125, %v79_v13  ;;  %v115_v35 = vsub.f32 %v66_v0, %v83_v12 }
  0x88   :  { %v89_v17 = vsub.f32 %v85_v16, %v87_v15 }
  0x8a   :  { %v91_v18 = vmax.f32 %v89_v17, 0.0 }
  0x8b   :  { %v74_v19 = vpop.xlane.xlu0 %73 }
  0x8c   :  { %v93_v20 = vadd.f32 1e-05, %v91_v18  ;;  %v84_v21 = vmul.f32 0.03125, %v74_v19 }
  0x8d   :  { %v82_v22 = vpop.xlane.xlu1 %81 }
  0x8e   :  { %205 = vrsqrt.f32 %v93_v20  ;;  %v88_v23 = vmul.f32 %v84_v21, %v84_v21  ;;  %v86_v24 = vmul.f32 0.03125, %v82_v22  ;;  %vm101_vm2 = vweird.f32 %v93_v20 }
  0x8f   :  { %v116_v47 = vsub.f32 %v363_v3, %v84_v21 }
  0x90   :  { %v90_v25 = vsub.f32 %v86_v24, %v88_v23 }
  0x92   :  { %v92_v26 = vmax.f32 %v90_v25, 0.0 }
  0x94   :  { %v206_v27 = vpop.eup %205  ;;  %v94_v29 = vadd.f32 1e-05, %v92_v26 }
  0x95   :  { %v96_v28 = vmul.f32 %v206_v27, %v93_v20  ;;  %vm102_vm1 = vweird.f32 %v206_v27 }
  0x96   :  { %207 = vrsqrt.f32 %v94_v29  ;;  %vm103_vm3 = vmor %vm101_vm2, %vm102_vm1  ;;  %vm111_vm5 = vweird.f32 %v94_v29 }
  0x97   :  { %v97_v30 = vmul.f32 %v206_v27, %v96_v28 }
  0x99   :  { %v98_v31 = vmul.f32 0.5, %v97_v30 }
  0x9b   :  { %v99_v32 = vsub.f32 1.5, %v98_v31 }
  0x9c   :  { %v208_v33 = vpop.eup %207 }
  0x9d   :  { %v100_v34 = vmul.f32 %v206_v27, %v99_v32  ;;  %v106_v36 = vmul.f32 %v208_v33, %v94_v29  ;;  %vm112_vm4 = vweird.f32 %v208_v33 }
  0x9e   :  { %vm113_vm6 = vmor %vm111_vm5, %vm112_vm4 }
  0x9f   :  { %v104_v38 = vsel %vm103_vm3, %v206_v27, %v100_v34  ;;  %v107_v39 = vmul.f32 %v208_v33, %v106_v36 }
  0xa0   :  { %v117_v40 = vmul.f32 %v115_v35, %v104_v38 }
  0xa1   :  { %v108_v42 = vmul.f32 0.5, %v107_v39 }
  0xa2   :  { %v123_v43 = vmul.f32 %v202_v37, %v117_v40 }
  0xa3   :  { %v109_v44 = vsub.f32 1.5, %v108_v42 }
  0xa4   :  { %v129_v45 = vadd.f32 %v203_v41, %v123_v43 }
  0xa5   :  { %v110_v46 = vmul.f32 %v208_v33, %v109_v44 }
  0xa6   :  { %190 = vmatmul.msk.f32.vlgmr.msra.gmra.mxu0 %vm68_vm0, %v129_v45 }
  0xa7   :  { %v114_v48 = vsel %vm113_vm6, %v208_v33, %v110_v46 }
  0xa8   :  { %v118_v49 = vmul.f32 %v116_v47, %v114_v48 }
  0xaa   :  { %v124_v50 = vmul.f32 %v202_v37, %v118_v49 }
  0xac   :  { %v130_v51 = vadd.f32 %v203_v41, %v124_v50 }
  0xae   :  { %191 = vmatmul.msk.f32.vlgmr.msra.gmra.mxu1 %vm68_vm0, %v130_v51 }
 0x123   :  { %v162_v53 = vpop.f32.mrf.mxu0 }
 0x124   :  { %v163_v54 = vadd.f32 %v204_v52, %v162_v53 }
 0x126   :  { %168 = vst.msk [vmem:[#allocation8] sm:$0xff] %vm68_vm0, %v163_v54 }
 0x12b   :  { %v165_v55 = vpop.f32.mrf.mxu1 }
 0x12c   :  { %v166_v56 = vadd.f32 %v204_v52, %v165_v55 }
 0x12e   :  { %169 = vst.msk [vmem:[#allocation8 + $0x8] sm:$0xff] %vm68_vm0, %v166_v56 }
 0x12f   :  { %182 = dma.vmem_to_hbm [thread:$0]  %s175_s11, 256, %s177_s14, [#allocation4], %s313_s28, %s313_s28, %s314_s29  }
 0x130   :  { %309 = dma.done.wait [#allocation4], 256  }
 0x131   :  { %310 = vsyncadd [#allocation4], 4294967040 }
 0x132   :  { %187 = vsyncpa [#allocation3], 1 }
 0x133   :  { %188 = vsyncpa [#allocation6], 1 }
 0x134   :  { %189 = vsyncpa [#allocation4], 1 }

</bundles_post_ra>
